<compile_context>
chip_gen: v7x
topology: tpu7x:2x2x1
jax: 0.10.0
libtpu: 0.0.40
codegen_flags: <defaults>
</compile_context>

<pallas_src>
import functools

import jax
import jax.numpy as jnp
from jax.experimental import pallas as pl
from jax.experimental.pallas import tpu as pltpu


def _cdiv(a, b):
    return -(-a // b)


def _round_up(a, m):
    return _cdiv(a, m) * m


def _sd_ce_kernel(x_ref, t_ref, lamh_ref, gam_ref, o_ref, acc_ref, *, n_valid, tile_n):
    i = pl.program_id(0)

    @pl.when(i == 0)
    def _():
        acc_ref[...] = jnp.zeros_like(acc_ref)

    # bf16/f32 logits arrive in their HBM dtype; cast only the VMEM tile.
    x = x_ref[...].astype(jnp.float32)          # (TN, C)
    t = t_ref[...]                              # (TN, 1) int32 targets
    lam_half = lamh_ref[...]                    # (TN, 1) f32, = 0.5 * lambda_[target]
    gam = gam_ref[...]                          # (1, C)  f32 per-class gamma

    tn, c = x.shape
    col = jax.lax.broadcasted_iota(jnp.int32, (tn, c), 1)

    # --- cross entropy (numerically stable log-sum-exp); exact f32 VPU/XLU reductions ---
    m = jnp.max(x, axis=1, keepdims=True)                                # (TN, 1)
    p = jnp.exp(x - m)                                                   # EUP
    exp_sum = jnp.sum(p, axis=1, keepdims=True)                          # (TN, 1)
    lse = m + jnp.log(exp_sum)
    x_t = jnp.sum(jnp.where(col == t, x, 0.0), axis=1, keepdims=True)    # logit @ target

    # --- spectral-decoupling regularizer ---
    d = x - gam
    sq = jnp.sum(d * d, axis=1, keepdims=True)                           # sum_j (x - gamma)^2

    # Fused per-row (lane-1) chain: ce + 0.5*lambda_[t]*sq  (0.5 already folded into lam_half).
    contrib = (lse - x_t) + lam_half * sq                                # (TN, 1)

    # Tail masking runs only on the tile that straddles n_valid; interior tiles skip it.
    tile_start = i * tile_n
    is_tail = tile_start + tile_n > n_valid

    @pl.when(jnp.logical_not(is_tail))
    def _():
        acc_ref[...] = acc_ref[...] + contrib

    @pl.when(is_tail)
    def _():
        row = jax.lax.broadcasted_iota(jnp.int32, (tn, 1), 0)
        valid = (tile_start + row) < n_valid
        # where-select (not multiply) so garbage/Inf in out-of-bounds rows cannot leak in.
        acc_ref[...] = acc_ref[...] + jnp.where(valid, contrib, 0.0)

    @pl.when(i == pl.num_programs(0) - 1)
    def _():
        total = jnp.sum(acc_ref[...], keepdims=True)                     # (1, 1)
        # Lane-dense (8,128) output block; the wrapper reads element [0, 0].
        o_ref[...] = jnp.broadcast_to(total * jnp.float32(1.0 / n_valid), o_ref.shape)


def sd_cross_entropy_loss(logits, targets, lambda_, gamma, *, tile_n=None):
    """logits: (N, C) float32/bfloat16; targets: (N,) int; lambda_/gamma: scalar or (C,).

    Returns scalar float32 loss (mean reduction), matching SdCrossEntropyLoss.forward.
    """
    n, c = logits.shape
    itemsize = jnp.dtype(logits.dtype).itemsize
    align = 16 if itemsize < 4 else 8            # sublane packing: 8 rows f32/i32, 16 rows bf16

    # Generation-aware VMEM budgeting (v7x has 64 MiB per core, v5e/v6e have 128 MiB).
    try:
        info = pltpu.get_tpu_info()
    except Exception:                            # pragma: no cover - interpret/unknown backends
        info = None
    vmem_cap = getattr(info, "vmem_capacity_bytes", None) or (64 * 1024 * 1024)
    vmem_limit = max(int(0.45 * vmem_cap), 16 * 1024 * 1024)

    if tile_n is None:
        # Per-row working set: double-buffered input + ~6 full-tile f32 temporaries
        # (x cast, p, where-select, d, d*d, iota) + lane-padded (TN,1) buffers.
        per_row_bytes = c * (2 * itemsize + 6 * 4) + 6 * 512
        budget = int(0.30 * vmem_cap)
        tile_n = max(align, min(1024, budget // max(per_row_bytes, 1)))
    tile_n = max(align, (tile_n // align) * align)
    tile_n = min(tile_n, _round_up(n, align))

    n_tiles = _cdiv(n, tile_n)

    # Tiny per-row auxiliaries (no padding of the big logits array anywhere).
    t = targets.astype(jnp.int32).reshape(n, 1)

    lam_vec = jnp.asarray(lambda_, jnp.float32)
    if lam_vec.ndim == 0:
        lam_rows = jnp.full((n,), lam_vec, jnp.float32)
    else:
        lam_rows = lam_vec.astype(jnp.float32)[targets]
    lam_half = (0.5 * lam_rows).reshape(n, 1)

    gam_vec = jnp.asarray(gamma, jnp.float32)
    if gam_vec.ndim == 0:
        gam2 = jnp.full((1, c), gam_vec, jnp.float32)
    else:
        gam2 = gam_vec.astype(jnp.float32).reshape(1, c)

    kernel = functools.partial(_sd_ce_kernel, n_valid=n, tile_n=tile_n)

    out = pl.pallas_call(
        kernel,
        out_shape=jax.ShapeDtypeStruct((8, 128), jnp.float32),
        grid_spec=pltpu.PrefetchScalarGridSpec(
            num_scalar_prefetch=0,
            grid=(n_tiles,),
            in_specs=[
                pl.BlockSpec((tile_n, c), lambda i: (i, 0)),   # logits (HBM dtype)
                pl.BlockSpec((tile_n, 1), lambda i: (i, 0)),   # targets
                pl.BlockSpec((tile_n, 1), lambda i: (i, 0)),   # 0.5*lambda_[target]
                pl.BlockSpec((1, c), lambda i: (0, 0)),        # gamma (per-class)
            ],
            out_specs=pl.BlockSpec((8, 128), lambda i: (0, 0)),
            scratch_shapes=[pltpu.VMEM((tile_n, 1), jnp.float32)],   # per-row accumulator
        ),
        compiler_params=pltpu.CompilerParams(
            dimension_semantics=("arbitrary",),
            vmem_limit_bytes=int(vmem_limit),
        ),
    )(logits, t, lam_half, gam2)

    return out[0, 0]


def _reference(logits, targets, lam, gam):
    x = logits.astype(jnp.float32)
    logp = jax.nn.log_softmax(x, axis=1)
    ce = -jnp.take_along_axis(logp, targets[:, None], axis=1)[:, 0]
    lam = jnp.asarray(lam, jnp.float32)
    lam_t = lam[targets] if lam.ndim else lam
    gam = jnp.asarray(gam, jnp.float32).reshape(1, -1)
    reg = 0.5 * lam_t * jnp.sum((x - gam) ** 2, axis=1)
    return jnp.mean(ce) + jnp.mean(reg)


if __name__ == "__main__":
    key = jax.random.PRNGKey(0)
    k1, k2, k3, k4 = jax.random.split(key, 4)

    # --- demo 1: small f32 case, per-class lambda_/gamma, single exact-fit tile ---
    N, C = 16, 32
    logits = jax.random.normal(k1, (N, C), dtype=jnp.float32)
    targets = jax.random.randint(k2, (N,), 0, C, dtype=jnp.int32)
    lambda_per_class = 0.5 + 0.05 * jnp.arange(C, dtype=jnp.float32)
    gamma_per_class = 0.1 * jnp.cos(jnp.arange(C, dtype=jnp.float32))

    loss = jax.block_until_ready(
        sd_cross_entropy_loss(logits, targets, lambda_per_class, gamma_per_class))
    ref = _reference(logits, targets, lambda_per_class, gamma_per_class)
    assert jnp.allclose(loss, ref, rtol=1e-4, atol=1e-4), (loss, ref)

    # --- demo 2: scalar lambda_/gamma path (matches the module's non-tensor branch) ---
    loss_s = jax.block_until_ready(sd_cross_entropy_loss(logits, targets, 1.0, 0.0))
    ref_s = _reference(logits, targets, 1.0, 0.0)
    assert jnp.allclose(loss_s, ref_s, rtol=1e-4, atol=1e-4), (loss_s, ref_s)

    # --- demo 3: bf16 logits, ragged batch (tail tile masked in-kernel, no wrapper pad) ---
    N2, C2 = 300, 200
    logits2 = jax.random.normal(k3, (N2, C2), dtype=jnp.float32).astype(jnp.bfloat16)
    targets2 = jax.random.randint(k4, (N2,), 0, C2, dtype=jnp.int32)
    lam2 = 1.0 + 0.01 * jnp.arange(C2, dtype=jnp.float32)
    gam2 = 0.05 * jnp.sin(jnp.arange(C2, dtype=jnp.float32))

    loss2 = jax.block_until_ready(
        sd_cross_entropy_loss(logits2, targets2, lam2, gam2, tile_n=64))
    ref2 = _reference(logits2, targets2, lam2, gam2)
    assert jnp.allclose(loss2, ref2, rtol=3e-4, atol=3e-4), (loss2, ref2)

    print("KERNEL_OK")
</pallas_src>

<mosaic_0001>
module attributes {stable_mosaic.version = 11 : i64} {
  func.func @_sd_ce_kernel(%arg0: i32, %arg1: memref<16x32xf32, #tpu.memory_space<vmem>>, %arg2: memref<16x1xi32, #tpu.memory_space<vmem>>, %arg3: memref<16x1xf32, #tpu.memory_space<vmem>>, %arg4: memref<1x32xf32, #tpu.memory_space<vmem>>, %arg5: memref<8x128xf32, #tpu.memory_space<vmem>>, %arg6: memref<16x1xf32, #tpu.memory_space<vmem>>) attributes {dimension_semantics = [#tpu.dimension_semantics<arbitrary>], iteration_bounds = array<i64: 1>, scalar_prefetch = 0 : i64, scratch_operands = 1 : i64, tpu.core_type = #tpu.core_type<tc>, window_params = [{transform_indices = @transform_0, window_bounds = array<i64: 16, 32>}, {transform_indices = @transform_1, window_bounds = array<i64: 16, 1>}, {transform_indices = @transform_2, window_bounds = array<i64: 16, 1>}, {pipeline_mode = #tpu.pipeline_mode<synchronous>, transform_indices = @transform_3, window_bounds = array<i64: 1, 32>}, {pipeline_mode = #tpu.pipeline_mode<synchronous>, transform_indices = @transform_4, window_bounds = array<i64: 8, 128>}]} {
    %c0_i32 = arith.constant 0 : i32
    %0 = arith.cmpi eq, %arg0, %c0_i32 : i32
    %1 = arith.extui %0 : i1 to i32
    %c0_i32_0 = arith.constant 0 : i32
    %2 = arith.cmpi ne, %1, %c0_i32_0 : i32
    scf.if %2 {
      %cst_18 = arith.constant 0.000000e+00 : f32
      %42 = vector.broadcast %cst_18 : f32 to vector<16x1xf32>
      %c0_19 = arith.constant 0 : index
      %c0_20 = arith.constant 0 : index
      %43 = vector.load %arg6[%c0_19, %c0_20] : memref<16x1xf32, #tpu.memory_space<vmem>>, vector<16x1xf32>
      tpu.vector_store %arg6[%c0_19, %c0_20], %42 {strides = array<i32>} : memref<16x1xf32, #tpu.memory_space<vmem>>, vector<16x1xf32>,
    } else {
    }
    %c0 = arith.constant 0 : index
    %c0_1 = arith.constant 0 : index
    %3 = vector.load %arg1[%c0, %c0_1] : memref<16x32xf32, #tpu.memory_space<vmem>>, vector<16x32xf32>
    %c0_2 = arith.constant 0 : index
    %c0_3 = arith.constant 0 : index
    %4 = vector.load %arg2[%c0_2, %c0_3] : memref<16x1xi32, #tpu.memory_space<vmem>>, vector<16x1xi32>
    %c0_4 = arith.constant 0 : index
    %c0_5 = arith.constant 0 : index
    %5 = vector.load %arg3[%c0_4, %c0_5] : memref<16x1xf32, #tpu.memory_space<vmem>>, vector<16x1xf32>
    %c0_6 = arith.constant 0 : index
    %c0_7 = arith.constant 0 : index
    %6 = vector.load %arg4[%c0_6, %c0_7] : memref<1x32xf32, #tpu.memory_space<vmem>>, vector<1x32xf32>
    %7 = tpu.iota {dimensions = array<i32: 1>} : vector<16x32xi32>
    %cst = arith.constant dense<0xFF800000> : vector<16xf32>
    %8 = vector.multi_reduction <maximumf>, %3, %cst [1] : vector<16x32xf32> to vector<16xf32>
    %9 = vector.shape_cast %8 : vector<16xf32> to vector<16x1xf32>
    %10 = vector.broadcast %9 : vector<16x1xf32> to vector<16x32xf32>
    %11 = arith.subf %3, %10 : vector<16x32xf32>
    %12 = math.exp %11 : vector<16x32xf32>
    %cst_8 = arith.constant dense<0.000000e+00> : vector<16xf32>
    %13 = vector.multi_reduction <add>, %12, %cst_8 [1] : vector<16x32xf32> to vector<16xf32>
    %14 = vector.shape_cast %13 : vector<16xf32> to vector<16x1xf32>
    %15 = math.log %14 : vector<16x1xf32>
    %16 = arith.addf %9, %15 : vector<16x1xf32>
    %17 = vector.broadcast %4 : vector<16x1xi32> to vector<16x32xi32>
    %18 = arith.cmpi eq, %7, %17 : vector<16x32xi32>
    %cst_9 = arith.constant 0.000000e+00 : f32
    %19 = vector.broadcast %cst_9 : f32 to vector<16x32xf32>
    %20 = arith.select %18, %3, %19 : vector<16x32xi1>, vector<16x32xf32>
    %cst_10 = arith.constant dense<0.000000e+00> : vector<16xf32>
    %21 = vector.multi_reduction <add>, %20, %cst_10 [1] : vector<16x32xf32> to vector<16xf32>
    %22 = vector.shape_cast %21 : vector<16xf32> to vector<16x1xf32>
    %23 = vector.broadcast %6 : vector<1x32xf32> to vector<16x32xf32>
    %24 = arith.subf %3, %23 : vector<16x32xf32>
    %25 = arith.mulf %24, %24 : vector<16x32xf32>
    %cst_11 = arith.constant dense<0.000000e+00> : vector<16xf32>
    %26 = vector.multi_reduction <add>, %25, %cst_11 [1] : vector<16x32xf32> to vector<16xf32>
    %27 = vector.shape_cast %26 : vector<16xf32> to vector<16x1xf32>
    %28 = arith.subf %16, %22 : vector<16x1xf32>
    %29 = arith.mulf %5, %27 : vector<16x1xf32>
    %30 = arith.addf %28, %29 : vector<16x1xf32>
    %c16_i32 = arith.constant 16 : i32
    %31 = arith.muli %arg0, %c16_i32 : i32
    %c16_i32_12 = arith.constant 16 : i32
    %32 = arith.addi %31, %c16_i32_12 : i32
    %c16_i32_13 = arith.constant 16 : i32
    %33 = arith.cmpi sgt, %32, %c16_i32_13 : i32
    %true = arith.constant true
    %34 = arith.xori %33, %true : i1
    %35 = arith.extui %34 : i1 to i32
    %c0_i32_14 = arith.constant 0 : i32
    %36 = arith.cmpi ne, %35, %c0_i32_14 : i32
    scf.if %36 {
      %c0_18 = arith.constant 0 : index
      %c0_19 = arith.constant 0 : index
      %42 = vector.load %arg6[%c0_18, %c0_19] : memref<16x1xf32, #tpu.memory_space<vmem>>, vector<16x1xf32>
      %43 = arith.addf %42, %30 : vector<16x1xf32>
      %c0_20 = arith.constant 0 : index
      %c0_21 = arith.constant 0 : index
      %44 = vector.load %arg6[%c0_20, %c0_21] : memref<16x1xf32, #tpu.memory_space<vmem>>, vector<16x1xf32>
      tpu.vector_store %arg6[%c0_20, %c0_21], %43 {strides = array<i32>} : memref<16x1xf32, #tpu.memory_space<vmem>>, vector<16x1xf32>,
    } else {
    }
    %37 = arith.extui %33 : i1 to i32
    %c0_i32_15 = arith.constant 0 : i32
    %38 = arith.cmpi ne, %37, %c0_i32_15 : i32
    scf.if %38 {
      %42 = tpu.iota {dimensions = array<i32: 0>} : vector<16x1xi32>
      %43 = vector.broadcast %31 : i32 to vector<16x1xi32>
      %44 = arith.addi %43, %42 : vector<16x1xi32>
      %c16_i32_18 = arith.constant 16 : i32
      %45 = vector.broadcast %c16_i32_18 : i32 to vector<16x1xi32>
      %46 = arith.cmpi slt, %44, %45 : vector<16x1xi32>
      %c0_19 = arith.constant 0 : index
      %c0_20 = arith.constant 0 : index
      %47 = vector.load %arg6[%c0_19, %c0_20] : memref<16x1xf32, #tpu.memory_space<vmem>>, vector<16x1xf32>
      %cst_21 = arith.constant 0.000000e+00 : f32
      %48 = vector.broadcast %cst_21 : f32 to vector<16x1xf32>
      %49 = arith.select %46, %30, %48 : vector<16x1xi1>, vector<16x1xf32>
      %50 = arith.addf %47, %49 : vector<16x1xf32>
      %c0_22 = arith.constant 0 : index
      %c0_23 = arith.constant 0 : index
      %51 = vector.load %arg6[%c0_22, %c0_23] : memref<16x1xf32, #tpu.memory_space<vmem>>, vector<16x1xf32>
      tpu.vector_store %arg6[%c0_22, %c0_23], %50 {strides = array<i32>} : memref<16x1xf32, #tpu.memory_space<vmem>>, vector<16x1xf32>,
    } else {
    }
    %c0_i32_16 = arith.constant 0 : i32
    %39 = arith.cmpi eq, %arg0, %c0_i32_16 : i32
    %40 = arith.extui %39 : i1 to i32
    %c0_i32_17 = arith.constant 0 : i32
    %41 = arith.cmpi ne, %40, %c0_i32_17 : i32
    scf.if %41 {
      %c0_18 = arith.constant 0 : index
      %c0_19 = arith.constant 0 : index
      %42 = vector.load %arg6[%c0_18, %c0_19] : memref<16x1xf32, #tpu.memory_space<vmem>>, vector<16x1xf32>
      %43 = vector.shape_cast %42 : vector<16x1xf32> to vector<1x16x1xf32>
      %cst_20 = arith.constant dense<0.000000e+00> : vector<1xf32>
      %44 = vector.multi_reduction <add>, %43, %cst_20 [1, 2] : vector<1x16x1xf32> to vector<1xf32>
      %45 = vector.shape_cast %44 : vector<1xf32> to vector<1x1x1xf32>
      %46 = vector.extract %45[0, 0, 0] : f32 from vector<1x1x1xf32>
      %47 = vector.broadcast %46 : f32 to vector<1x1xf32>
      %cst_21 = arith.constant 6.250000e-02 : f32
      %48 = vector.broadcast %cst_21 : f32 to vector<1x1xf32>
      %49 = arith.mulf %47, %48 : vector<1x1xf32>
      %50 = vector.shape_cast %49 : vector<1x1xf32> to vector<1x1xf32>
      %51 = vector.broadcast %50 : vector<1x1xf32> to vector<8x128xf32>
      %c0_22 = arith.constant 0 : index
      %c0_23 = arith.constant 0 : index
      %52 = vector.load %arg5[%c0_22, %c0_23] : memref<8x128xf32, #tpu.memory_space<vmem>>, vector<8x128xf32>
      tpu.vector_store %arg5[%c0_22, %c0_23], %51 {strides = array<i32>} : memref<8x128xf32, #tpu.memory_space<vmem>>, vector<8x128xf32>,
    } else {
    }
    return
  }
  func.func @transform_0(%arg0: i32) -> (i32, i32) {
    %c0_i32 = arith.constant 0 : i32
    %c0_i32_0 = arith.constant 0 : i32
    return %arg0, %c0_i32 : i32, i32
  }
  func.func @transform_1(%arg0: i32) -> (i32, i32) {
    %c0_i32 = arith.constant 0 : i32
    %c0_i32_0 = arith.constant 0 : i32
    return %arg0, %c0_i32 : i32, i32
  }
  func.func @transform_2(%arg0: i32) -> (i32, i32) {
    %c0_i32 = arith.constant 0 : i32
    %c0_i32_0 = arith.constant 0 : i32
    return %arg0, %c0_i32 : i32, i32
  }
  func.func @transform_3(%arg0: i32) -> (i32, i32) {
    %c0_i32 = arith.constant 0 : i32
    %c0_i32_0 = arith.constant 0 : i32
    %c0_i32_1 = arith.constant 0 : i32
    return %c0_i32, %c0_i32_0 : i32, i32
  }
  func.func @transform_4(%arg0: i32) -> (i32, i32) {
    %c0_i32 = arith.constant 0 : i32
    %c0_i32_0 = arith.constant 0 : i32
    %c0_i32_1 = arith.constant 0 : i32
    return %c0_i32, %c0_i32_0 : i32, i32
  }
}

</mosaic_0001>

<bundles_post_ra>
// kernel: tpu_custom_call.1
= control target key start
LH: loop header
LB: loop body
LE: loop exit
PB: predicated region body
PF: predicated region fallthrough
CT: control target
= control target key end

     0   :  { %vm34_vm0 = vcmask 261120   ;;  %v206_v4 = vmov 0   ;;  %s281_s0 = inlined_call_operand.vmem [shape: f32[16,32], index: 0, kind: input, shape index: {}]   ;;  %s282_s1 = inlined_call_operand.vmem [shape: s32[16,1], index: 1, kind: input, shape index: {}]   ;;  %s283_s2 = inlined_call_operand.vmem [shape: f32[16,1], index: 2, kind: input, shape index: {}]   ;;  %s284_s3 = inlined_call_operand.vmem [shape: f32[1,32], index: 3, kind: input, shape index: {}]   ;;  %s285_s4 = inlined_call_operand.hbm [shape: f32[8,128], index: 4, kind: output, shape index: {}]  }
   0x1   :  { %v25_v0 = vld [vmem:[%s281_s0] sm:$0xff]  ;;  %v26_v1 = vld [vmem:[%s281_s0 + $0x8] sm:$0xff]  ;;  %172 = vset.pattern.permute.xlu1 %v206_v4  ;;  %173 = vset.pattern.permute.xlu0 %v206_v4 }
   0x2   :  { %v27_v2 = vld [vmem:[%s282_s1] sm:$0xff]  ;;  %v35_v3 = vsel %vm34_vm0, %v25_v0, -inf }
   0x3   :  { %9 = vsyncpa [#allocation4], 0  ;;  %36 = vmax.xlane.f32.xlu0 %v35_v3  ;;  %60 = vperm.xlu1 %172, %v27_v2   ;;  %v38_v5 = vsel %vm34_vm0, %v26_v1, -inf  ;;  %v28_v6 = vld [vmem:[%s282_s1 + $0x8] sm:$0xff]  ;;  %v32_v11 = vlaneseq  ;;  %v166_v19 = vld [vmem:[%s284_s3] ss:$0 sm:$0xff] }
   0x4   :  { %v81_v22 = vsub.f32 %v25_v0, %v166_v19  ;;  %v82_v28 = vsub.f32 %v26_v1, %v166_v19  ;;  %vm22_vm3 = vcmask 7168   ;;  %v207_v32 = vmov 0.0   ;;  %v29_v38 = vld [vmem:[%s283_s2] sm:$0xff]  ;;  %v30_v44 = vld [vmem:[%s283_s2 + $0x8] sm:$0xff]  ;;  %s208_s2 = smov [#allocation3]  }
   0x5   :  { %v33_v15 = vand.u32 127, %v32_v11  ;;  %23 = vst.msk [vmem:[#allocation2] sm:$0xff] %vm22_vm3, %v207_v32  ;;  %24 = vst.msk [vmem:[#allocation2 + $0x8] sm:$0xff] %vm22_vm3, %v207_v32  ;;  %s158_s26 = sshll.u32 %s208_s2, 4  ;;  %s159_s26 = int_to_ptr.vmem [resolvable:$true] %s158_s26 }
   0x6   :  { %v83_v27 = vmul.f32 %v81_v22, %v81_v22  ;;  %v84_v30 = vmul.f32 %v82_v28, %v82_v28  ;;  %s182_s28 = scalar_lea.vmem %s159_s26, 128  ;;  %p187_p1 = scmp.lt.s32.totalorder %s159_s26, %s159_s26 }
   0x7   :  { %39 = vmax.xlane.f32.xlu0 %v38_v5  ;;  %63 = vperm.xlu1 %172, %v28_v6   ;;  %p183_p0 = scmp.ne.s32.totalorder %s159_s26, %s182_s28  ;;  %p188_p2 = scmp.lt.s32.totalorder %s182_s28, %s182_s28 }
   0x8   :  { %v85_v29 = vsel %vm34_vm0, %v83_v27, 0.0  ;;  %v88_v31 = vsel %vm34_vm0, %v84_v30, 0.0 }
   0x9   :  { %p189_p3 = por %p188_p2, %p187_p1 }
   0xb   :  { %p190_p4 = pnand %p189_p3, %p183_p0 }
   0xc   :  { %v104_v48 = vld [vmem:[#allocation2] sm:$0xff]  ;;  %v105_v54 = vld [vmem:[#allocation2 + $0x8] sm:$0xff] }
  0x82   :  { %v61_v14 = vpop.permute.xlu1 %60 }
  0x83   :  { %vm65_vm1 = vcmp.eq.s32.totalorder %v33_v15, %v61_v14 }
  0x84   :  { %v67_v18 = vsel %vm65_vm1, %v25_v0, 0.0 }
  0x85   :  { %v69_v21 = vsel %vm34_vm0, %v67_v18, 0.0 }
  0x86   :  { %v64_v16 = vpop.permute.xlu1 %63 }
  0x87   :  { %vm66_vm2 = vcmp.eq.s32.totalorder %v33_v15, %v64_v16 }
  0x88   :  { %v68_v24 = vsel %vm66_vm2, %v26_v1, 0.0 }
  0x89   :  { %v72_v26 = vsel %vm34_vm0, %v68_v24, 0.0 }
  0x90   :  { %v37_v7 = vpop.xlane.xlu0 %36 }
  0x91   :  { %v41_v8 = vsub.f32 %v25_v0, %v37_v7 }
  0x93   :  { %v43_v9 = vmul.f32 1.442695, %v41_v8 }
  0x94   :  { %v40_v10 = vpop.xlane.xlu0 %39 }
  0x95   :  { %174 = vpow2.f32 %v43_v9  ;;  %v42_v12 = vsub.f32 %v26_v1, %v40_v10 }
  0x97   :  { %v45_v13 = vmul.f32 1.442695, %v42_v12 }
  0x99   :  { %176 = vpow2.f32 %v45_v13 }
  0x9f   :  { %v175_v17 = vpop.eup %174 }
  0xa0   :  { %v47_v20 = vsel %vm34_vm0, %v175_v17, 0.0 }
  0xa1   :  { %48 = vadd.xlane.f32.xlu0 %v47_v20 }
  0xa3   :  { %v177_v23 = vpop.eup %176 }
  0xa4   :  { %v50_v25 = vsel %vm34_vm0, %v177_v23, 0.0 }
  0xa5   :  { %70 = vadd.xlane.f32.xlu0 %v69_v21  ;;  %51 = vadd.xlane.f32.xlu1 %v50_v25 }
  0xa9   :  { %73 = vadd.xlane.f32.xlu0 %v72_v26 }
  0xad   :  { %86 = vadd.xlane.f32.xlu0 %v85_v29 }
  0xb1   :  { %89 = vadd.xlane.f32.xlu0 %v88_v31 }
 0x12e   :  { %v49_v33 = vpop.xlane.xlu0 %48 }
 0x12f   :  { %178 = vlog2.f32 %v49_v33 }
 0x132   :  { %v52_v34 = vpop.xlane.xlu1 %51  ;;  %v71_v35 = vpop.xlane.xlu0 %70 }
 0x133   :  { %180 = vlog2.f32 %v52_v34 }
 0x136   :  { %v74_v36 = vpop.xlane.xlu0 %73 }
 0x139   :  { %v179_v37 = vpop.eup %178 }
 0x13a   :  { %v54_v39 = vmul.f32 0.6931472, %v179_v37  ;;  %v87_v40 = vpop.xlane.xlu0 %86 }
 0x13b   :  { %v93_v42 = vmul.f32 %v87_v40, %v29_v38 }
 0x13c   :  { %v57_v41 = vadd.f32 %v54_v39, %v37_v7 }
 0x13d   :  { %v181_v43 = vpop.eup %180 }
 0x13e   :  { %v56_v45 = vmul.f32 0.6931472, %v181_v43  ;;  %v91_v46 = vsub.f32 %v57_v41, %v71_v35  ;;  %v90_v47 = vpop.xlane.xlu0 %89 }
 0x13f   :  { %v94_v51 = vmul.f32 %v90_v47, %v30_v44 }
 0x140   :  { %v58_v49 = vadd.f32 %v56_v45, %v40_v10  ;;  %v95_v50 = vadd.f32 %v93_v42, %v91_v46 }
 0x142   :  { %v92_v52 = vsub.f32 %v58_v49, %v74_v36  ;;  %v106_v53 = vadd.f32 %v104_v48, %v95_v50 }
 0x144   :  { %109 = vst.msk [vmem:[#allocation2] sm:$0xff] %vm22_vm3, %v106_v53  ;;  %v96_v55 = vadd.f32 %v94_v51, %v92_v52 }
 0x146   :  { %v107_v56 = vadd.f32 %v105_v54, %v96_v55 }
 0x148   :  { %110 = vst.msk [vmem:[#allocation2 + $0x8] sm:$0xff] %vm22_vm3, %v107_v56 }
 0x14b   :  { %v134_v57 = vld [vmem:[#allocation2] sm:$0xff] }
 0x14c   :  { %v137_v59 = vsel %vm22_vm3, %v134_v57, 0.0 }
 0x14f   :  { %v135_v58 = vld [vmem:[#allocation2 + $0x8] sm:$0xff] }
 0x150   :  { %v138_v60 = vsel %vm22_vm3, %v135_v58, 0.0 }
 0x151   :  { %v139_v61 = vadd.f32 %v138_v60, %v137_v59 }
 0x153   :  { %140 = vadd.xlane.f32.xlu0 %v139_v61 }
 0x1e0   :  { %v141_v62 = vpop.xlane.xlu0 %140 }
 0x1e1   :  { %v142_v63 = vrot.slane %v141_v62, 4 }
 0x1e3   :  { %v143_v0 = vadd.f32 %v142_v63, %v141_v62 }
 0x1e5   :  { %v144_v1 = vrot.slane %v143_v0, 2 }
 0x1e7   :  { %v145_v2 = vadd.f32 %v144_v1, %v143_v0 }
 0x1e9   :  { %v146_v3 = vrot.slane %v145_v2, 1 }
 0x1eb   :  { %v147_v4 = vadd.f32 %v146_v3, %v145_v2 }
 0x1ed   :  { %167 = vpush %v147_v4 }
 0x21e   :  { %s168_s27 = spop %167 }
 0x21f   :  { %v149_v5 = vstv %s168_s27 }
 0x220   :  { %v150_v6 = vmul.f32 0.0625, %v149_v5 }
 0x222   :  { %151 = vst [vmem:[#allocation3] sm:$0xff] %v150_v6 }
 0x223   :  { %193 = shalt.err (!%p190_p4)
}
 0x224   :  { %s194_s5 = scalar_lea.hbm %s285_s4, 128 }
 0x225   :  { %p195_p5 = scmp.ne.s32.totalorder %s285_s4, %s194_s5  ;;  %p198_p6 = scmp.lt.u32.totalorder %s194_s5, %s285_s4 }
 0x227   :  { %p200_p7 = pnand %p198_p6, %p195_p5 }
 0x229   :  { %203 = shalt.err (!%p200_p7)
}
 0x22a   :  { %161 = dma.vmem_to_hbm [thread:$0]  %s159_s26, 128, %s285_s4, [#allocation4]  }
 0x22b   :  { %204 = dma.done.wait [#allocation4], 128  }
 0x22c   :  { %205 = vsyncadd [#allocation4], 4294967168 }
 0x22d   :  { %165 = vsyncpa [#allocation4], 1 }

</bundles_post_ra>
